<compile_context>
chip_gen: v7x
topology: tpu7x:2x2x1
jax: 0.10.0
libtpu: 0.0.40
codegen_flags: <defaults>
</compile_context>

<pallas_src>
import functools

import jax
import jax.numpy as jnp
from jax import lax
from jax.experimental import pallas as pl
from jax.experimental.pallas import tpu as pltpu  # noqa: F401  (TPU backend assumed)

LEAKY_SLOPE = 0.01
BN_EPS = 1e-5
LANE = 128
SUBLANE = 8


def _round_up(n, m):
    return (n + m - 1) // m * m


def _pad2(a, shape):
    out = jnp.zeros(shape, a.dtype)
    return out.at[: a.shape[0], : a.shape[1]].set(a)


# ----------------------------- fused Pallas kernel ----------------------------- #

def _fused_mlp_kernel(n_fc, x_ref, w0_ref, b0_ref, *refs):
    # refs layout: n_fc * (scale, shift, w, b), then
    #   s_out, t_out, w_out, s_inf, t_inf, w_inf, b_heads, out_ref
    out_ref = refs[-1]
    fc_refs = refs[: 4 * n_fc]
    s_out, t_out, w_out, s_inf, t_inf, w_inf, b_heads = refs[4 * n_fc:-1]

    # layer 0: plain Linear (f32 accumulate on the MXU)
    h = jnp.dot(x_ref[...], w0_ref[...],
                preferred_element_type=jnp.float32) + b0_ref[...]

    # hidden FC blocks: folded BN -> LeakyReLU -> Dropout(identity, eval) -> Linear
    for i in range(n_fc):  # static trace-time loop (small, fixed layer count)
        scale = fc_refs[4 * i][...]
        shift = fc_refs[4 * i + 1][...]
        w = fc_refs[4 * i + 2]
        b = fc_refs[4 * i + 3]
        xn = h * scale + shift
        a = jnp.where(xn >= 0, xn, LEAKY_SLOPE * xn)
        h = jnp.dot(a, w[...], preferred_element_type=jnp.float32) + b[...]

    # heads: out/inf each have their own BN/LeakyReLU; their linear weights are
    # pre-embedded into disjoint lane ranges of lane-dense (HID_PAD, HEAD_PAD)
    # slabs, so both head matmuls accumulate into one 128-lane output block.
    xo = h * s_out[...] + t_out[...]
    ao = jnp.where(xo >= 0, xo, LEAKY_SLOPE * xo)
    xi = h * s_inf[...] + t_inf[...]
    ai = jnp.where(xi >= 0, xi, LEAKY_SLOPE * xi)
    y = (jnp.dot(ao, w_out[...], preferred_element_type=jnp.float32)
         + jnp.dot(ai, w_inf[...], preferred_element_type=jnp.float32)
         + b_heads[...])
    out_ref[...] = y.astype(out_ref.dtype)


def _full_spec(shape):
    # single-block spec: whole (padded, lane-dense) array resident in VMEM
    return pl.BlockSpec(shape, lambda: (0,) * len(shape))


def _fused_pallas_forward(fused, x_pad):
    n_fc = len(fused["fc"])
    B_PAD = x_pad.shape[0]
    HEAD_PAD = fused["b_heads"].shape[1]

    inputs = [x_pad, fused["w0"], fused["b0"]]
    for p in fused["fc"]:
        inputs += [p["scale"], p["shift"], p["w"], p["b"]]
    inputs += [fused["s_out"], fused["t_out"], fused["w_out"],
               fused["s_inf"], fused["t_inf"], fused["w_inf"], fused["b_heads"]]

    kernel = functools.partial(_fused_mlp_kernel, n_fc)
    return pl.pallas_call(
        kernel,
        out_shape=jax.ShapeDtypeStruct((B_PAD, HEAD_PAD), jnp.float32),
        in_specs=[_full_spec(a.shape) for a in inputs],
        out_specs=_full_spec((B_PAD, HEAD_PAD)),
    )(*inputs)


# ------------------------- param folding / padding ------------------------- #

def _fold_bn(p):
    # eval-mode BN(x) = x*scale + shift with running stats
    scale = p["gamma"] * lax.rsqrt(p["var"] + BN_EPS)
    shift = p["beta"] - p["mean"] * scale
    return scale, shift


def prepare_fused_params(params):
    in_dim, hid_dim = params["layers"][0]["w"].shape
    out_dim = params["out"]["w"].shape[1]
    IN_PAD = _round_up(in_dim, LANE)
    HID_PAD = _round_up(hid_dim, LANE)
    HEAD_PAD = _round_up(2 * out_dim, LANE)

    fused = {
        "w0": _pad2(params["layers"][0]["w"], (IN_PAD, HID_PAD)),
        "b0": _pad2(params["layers"][0]["b"], (1, HID_PAD)),
        "fc": [],
    }
    for p in params["layers"][1:]:
        scale, shift = _fold_bn(p)
        fused["fc"].append({
            "scale": _pad2(scale, (1, HID_PAD)),
            "shift": _pad2(shift, (1, HID_PAD)),
            "w": _pad2(p["w"], (HID_PAD, HID_PAD)),
            "b": _pad2(p["b"], (1, HID_PAD)),
        })

    s_out, t_out = _fold_bn(params["out"])
    s_inf, t_inf = _fold_bn(params["inf"])
    fused["s_out"] = _pad2(s_out, (1, HID_PAD))
    fused["t_out"] = _pad2(t_out, (1, HID_PAD))
    fused["s_inf"] = _pad2(s_inf, (1, HID_PAD))
    fused["t_inf"] = _pad2(t_inf, (1, HID_PAD))

    # embed the two heads into disjoint lane ranges of one 128-wide output slab
    w_out = jnp.zeros((HID_PAD, HEAD_PAD), jnp.float32)
    w_out = w_out.at[:hid_dim, :out_dim].set(params["out"]["w"])
    w_inf = jnp.zeros((HID_PAD, HEAD_PAD), jnp.float32)
    w_inf = w_inf.at[:hid_dim, out_dim:2 * out_dim].set(params["inf"]["w"])
    b_heads = jnp.zeros((1, HEAD_PAD), jnp.float32)
    b_heads = b_heads.at[:, :out_dim].set(params["out"]["b"])
    b_heads = b_heads.at[:, out_dim:2 * out_dim].set(params["inf"]["b"])
    fused["w_out"] = w_out
    fused["w_inf"] = w_inf
    fused["b_heads"] = b_heads
    return fused


# --------------------------- parameter creation ----------------------------- #

def init_linear(key, in_dim, out_dim):
    kw, kb = jax.random.split(key)
    bound = 1.0 / jnp.sqrt(in_dim)
    # stored as [in, out] (pre-transposed relative to PyTorch's [out, in])
    w = jax.random.uniform(kw, (in_dim, out_dim), jnp.float32, -bound, bound)
    b = jax.random.uniform(kb, (1, out_dim), jnp.float32, -bound, bound)
    return {"w": w, "b": b}


def init_fc(key, in_dim, out_dim):
    klin, kg, kb2, km, kv = jax.random.split(key, 5)
    lin = init_linear(klin, in_dim, out_dim)
    gamma = 1.0 + 0.1 * jax.random.normal(kg, (1, in_dim), jnp.float32)
    beta = 0.1 * jax.random.normal(kb2, (1, in_dim), jnp.float32)
    mean = 0.1 * jax.random.normal(km, (1, in_dim), jnp.float32)
    var = 1.0 + 0.1 * jax.random.uniform(kv, (1, in_dim), jnp.float32)
    return {"gamma": gamma, "beta": beta, "mean": mean, "var": var,
            "w": lin["w"], "b": lin["b"]}


def init_mlp(key, in_dim, hid_dim, out_dim, n_layers):
    keys = jax.random.split(key, n_layers + 2)
    params = {"layers": [init_linear(keys[0], in_dim, hid_dim)]}
    for i in range(n_layers - 1):
        params["layers"].append(init_fc(keys[1 + i], hid_dim, hid_dim))
    params["out"] = init_fc(keys[n_layers], hid_dim, out_dim)
    params["inf"] = init_fc(keys[n_layers + 1], hid_dim, out_dim)
    return params


# ------------------------------- forward ------------------------------------ #

@jax.jit
def mlp_forward(params, x):
    out_dim = params["out"]["w"].shape[1]
    in_dim = params["layers"][0]["w"].shape[0]
    batch = x.shape[0]

    fused = prepare_fused_params(params)
    B_PAD = _round_up(batch, SUBLANE)
    IN_PAD = _round_up(in_dim, LANE)
    x_pad = _pad2(x, (B_PAD, IN_PAD))

    y = _fused_pallas_forward(fused, x_pad)   # (B_PAD, 128) lane-dense slab
    return y[:batch, :out_dim], y[:batch, out_dim:2 * out_dim]


# ------------------------- pure-JAX reference -------------------------------- #

def mlp_reference(params, x):
    def lin(p, x):
        return x @ p["w"] + p["b"]

    def fc(p, x):
        xn = (x - p["mean"]) * lax.rsqrt(p["var"] + BN_EPS) * p["gamma"] + p["beta"]
        h = jnp.where(xn >= 0, xn, LEAKY_SLOPE * xn)
        return h @ p["w"] + p["b"]

    x = lin(params["layers"][0], x)
    for p in params["layers"][1:]:
        x = fc(p, x)
    return fc(params["out"], x), fc(params["inf"], x)


# --------------------------------- main -------------------------------------- #

if __name__ == "__main__":
    in_dim, hid_dim, out_dim = 32, 64, 16
    param = {"n_layers": 3, "dropout": 0.1}
    batch = 8

    key = jax.random.PRNGKey(0)
    kparams, kx = jax.random.split(key)
    params = init_mlp(kparams, in_dim, hid_dim, out_dim, param["n_layers"])
    x = jax.random.normal(kx, (batch, in_dim), jnp.float32)

    out, inf = mlp_forward(params, x)
    out = jax.block_until_ready(out)
    inf = jax.block_until_ready(inf)

    ref_out, ref_inf = mlp_reference(params, x)
    assert out.shape == (batch, out_dim) and inf.shape == (batch, out_dim)
    assert jnp.allclose(out, ref_out, atol=1e-3, rtol=1e-3)
    assert jnp.allclose(inf, ref_inf, atol=1e-3, rtol=1e-3)

    print("KERNEL_OK")
</pallas_src>

<mosaic_0001>
module attributes {stable_mosaic.version = 11 : i64} {
  func.func @_fused_mlp_kernel(%arg0: memref<8x128xf32, #tpu.memory_space<vmem>>, %arg1: memref<128x128xf32, #tpu.memory_space<vmem>>, %arg2: memref<1x128xf32, #tpu.memory_space<vmem>>, %arg3: memref<1x128xf32, #tpu.memory_space<vmem>>, %arg4: memref<1x128xf32, #tpu.memory_space<vmem>>, %arg5: memref<128x128xf32, #tpu.memory_space<vmem>>, %arg6: memref<1x128xf32, #tpu.memory_space<vmem>>, %arg7: memref<1x128xf32, #tpu.memory_space<vmem>>, %arg8: memref<1x128xf32, #tpu.memory_space<vmem>>, %arg9: memref<128x128xf32, #tpu.memory_space<vmem>>, %arg10: memref<1x128xf32, #tpu.memory_space<vmem>>, %arg11: memref<1x128xf32, #tpu.memory_space<vmem>>, %arg12: memref<1x128xf32, #tpu.memory_space<vmem>>, %arg13: memref<128x128xf32, #tpu.memory_space<vmem>>, %arg14: memref<1x128xf32, #tpu.memory_space<vmem>>, %arg15: memref<1x128xf32, #tpu.memory_space<vmem>>, %arg16: memref<128x128xf32, #tpu.memory_space<vmem>>, %arg17: memref<1x128xf32, #tpu.memory_space<vmem>>, %arg18: memref<8x128xf32, #tpu.memory_space<vmem>>) attributes {dimension_semantics = [], scalar_prefetch = 0 : i64, scratch_operands = 0 : i64, tpu.core_type = #tpu.core_type<tc>} {
    %c0 = arith.constant 0 : index
    %c0_0 = arith.constant 0 : index
    %0 = vector.load %arg0[%c0, %c0_0] : memref<8x128xf32, #tpu.memory_space<vmem>>, vector<8x128xf32>
    %c0_1 = arith.constant 0 : index
    %c0_2 = arith.constant 0 : index
    %1 = vector.load %arg1[%c0_1, %c0_2] : memref<128x128xf32, #tpu.memory_space<vmem>>, vector<128x128xf32>
    %cst = arith.constant dense<0.000000e+00> : vector<8x128xf32>
    %2 = tpu.matmul %0, %1, %cst {dimension_numbers = #tpu.dot_dimension_numbers<[1], [0], [0], [1], [0, 0, 1, 1], [], []>} : vector<8x128xf32>, vector<128x128xf32>, vector<8x128xf32> -> vector<8x128xf32>
    %c0_3 = arith.constant 0 : index
    %c0_4 = arith.constant 0 : index
    %3 = vector.load %arg2[%c0_3, %c0_4] : memref<1x128xf32, #tpu.memory_space<vmem>>, vector<1x128xf32>
    %4 = vector.broadcast %3 : vector<1x128xf32> to vector<8x128xf32>
    %5 = arith.addf %2, %4 : vector<8x128xf32>
    %c0_5 = arith.constant 0 : index
    %c0_6 = arith.constant 0 : index
    %6 = vector.load %arg3[%c0_5, %c0_6] : memref<1x128xf32, #tpu.memory_space<vmem>>, vector<1x128xf32>
    %c0_7 = arith.constant 0 : index
    %c0_8 = arith.constant 0 : index
    %7 = vector.load %arg4[%c0_7, %c0_8] : memref<1x128xf32, #tpu.memory_space<vmem>>, vector<1x128xf32>
    %8 = vector.broadcast %6 : vector<1x128xf32> to vector<8x128xf32>
    %9 = arith.mulf %5, %8 : vector<8x128xf32>
    %10 = vector.broadcast %7 : vector<1x128xf32> to vector<8x128xf32>
    %11 = arith.addf %9, %10 : vector<8x128xf32>
    %cst_9 = arith.constant 0.000000e+00 : f32
    %12 = vector.broadcast %cst_9 : f32 to vector<8x128xf32>
    %13 = arith.cmpf oge, %11, %12 : vector<8x128xf32>
    %cst_10 = arith.constant 0.00999999977 : f32
    %14 = vector.broadcast %cst_10 : f32 to vector<8x128xf32>
    %15 = arith.mulf %14, %11 : vector<8x128xf32>
    %16 = arith.select %13, %11, %15 : vector<8x128xi1>, vector<8x128xf32>
    %c0_11 = arith.constant 0 : index
    %c0_12 = arith.constant 0 : index
    %17 = vector.load %arg5[%c0_11, %c0_12] : memref<128x128xf32, #tpu.memory_space<vmem>>, vector<128x128xf32>
    %cst_13 = arith.constant dense<0.000000e+00> : vector<8x128xf32>
    %18 = tpu.matmul %16, %17, %cst_13 {dimension_numbers = #tpu.dot_dimension_numbers<[1], [0], [0], [1], [0, 0, 1, 1], [], []>} : vector<8x128xf32>, vector<128x128xf32>, vector<8x128xf32> -> vector<8x128xf32>
    %c0_14 = arith.constant 0 : index
    %c0_15 = arith.constant 0 : index
    %19 = vector.load %arg6[%c0_14, %c0_15] : memref<1x128xf32, #tpu.memory_space<vmem>>, vector<1x128xf32>
    %20 = vector.broadcast %19 : vector<1x128xf32> to vector<8x128xf32>
    %21 = arith.addf %18, %20 : vector<8x128xf32>
    %c0_16 = arith.constant 0 : index
    %c0_17 = arith.constant 0 : index
    %22 = vector.load %arg7[%c0_16, %c0_17] : memref<1x128xf32, #tpu.memory_space<vmem>>, vector<1x128xf32>
    %c0_18 = arith.constant 0 : index
    %c0_19 = arith.constant 0 : index
    %23 = vector.load %arg8[%c0_18, %c0_19] : memref<1x128xf32, #tpu.memory_space<vmem>>, vector<1x128xf32>
    %24 = vector.broadcast %22 : vector<1x128xf32> to vector<8x128xf32>
    %25 = arith.mulf %21, %24 : vector<8x128xf32>
    %26 = vector.broadcast %23 : vector<1x128xf32> to vector<8x128xf32>
    %27 = arith.addf %25, %26 : vector<8x128xf32>
    %cst_20 = arith.constant 0.000000e+00 : f32
    %28 = vector.broadcast %cst_20 : f32 to vector<8x128xf32>
    %29 = arith.cmpf oge, %27, %28 : vector<8x128xf32>
    %cst_21 = arith.constant 0.00999999977 : f32
    %30 = vector.broadcast %cst_21 : f32 to vector<8x128xf32>
    %31 = arith.mulf %30, %27 : vector<8x128xf32>
    %32 = arith.select %29, %27, %31 : vector<8x128xi1>, vector<8x128xf32>
    %c0_22 = arith.constant 0 : index
    %c0_23 = arith.constant 0 : index
    %33 = vector.load %arg9[%c0_22, %c0_23] : memref<128x128xf32, #tpu.memory_space<vmem>>, vector<128x128xf32>
    %cst_24 = arith.constant dense<0.000000e+00> : vector<8x128xf32>
    %34 = tpu.matmul %32, %33, %cst_24 {dimension_numbers = #tpu.dot_dimension_numbers<[1], [0], [0], [1], [0, 0, 1, 1], [], []>} : vector<8x128xf32>, vector<128x128xf32>, vector<8x128xf32> -> vector<8x128xf32>
    %c0_25 = arith.constant 0 : index
    %c0_26 = arith.constant 0 : index
    %35 = vector.load %arg10[%c0_25, %c0_26] : memref<1x128xf32, #tpu.memory_space<vmem>>, vector<1x128xf32>
    %36 = vector.broadcast %35 : vector<1x128xf32> to vector<8x128xf32>
    %37 = arith.addf %34, %36 : vector<8x128xf32>
    %c0_27 = arith.constant 0 : index
    %c0_28 = arith.constant 0 : index
    %38 = vector.load %arg11[%c0_27, %c0_28] : memref<1x128xf32, #tpu.memory_space<vmem>>, vector<1x128xf32>
    %39 = vector.broadcast %38 : vector<1x128xf32> to vector<8x128xf32>
    %40 = arith.mulf %37, %39 : vector<8x128xf32>
    %c0_29 = arith.constant 0 : index
    %c0_30 = arith.constant 0 : index
    %41 = vector.load %arg12[%c0_29, %c0_30] : memref<1x128xf32, #tpu.memory_space<vmem>>, vector<1x128xf32>
    %42 = vector.broadcast %41 : vector<1x128xf32> to vector<8x128xf32>
    %43 = arith.addf %40, %42 : vector<8x128xf32>
    %cst_31 = arith.constant 0.000000e+00 : f32
    %44 = vector.broadcast %cst_31 : f32 to vector<8x128xf32>
    %45 = arith.cmpf oge, %43, %44 : vector<8x128xf32>
    %cst_32 = arith.constant 0.00999999977 : f32
    %46 = vector.broadcast %cst_32 : f32 to vector<8x128xf32>
    %47 = arith.mulf %46, %43 : vector<8x128xf32>
    %48 = arith.select %45, %43, %47 : vector<8x128xi1>, vector<8x128xf32>
    %c0_33 = arith.constant 0 : index
    %c0_34 = arith.constant 0 : index
    %49 = vector.load %arg14[%c0_33, %c0_34] : memref<1x128xf32, #tpu.memory_space<vmem>>, vector<1x128xf32>
    %50 = vector.broadcast %49 : vector<1x128xf32> to vector<8x128xf32>
    %51 = arith.mulf %37, %50 : vector<8x128xf32>
    %c0_35 = arith.constant 0 : index
    %c0_36 = arith.constant 0 : index
    %52 = vector.load %arg15[%c0_35, %c0_36] : memref<1x128xf32, #tpu.memory_space<vmem>>, vector<1x128xf32>
    %53 = vector.broadcast %52 : vector<1x128xf32> to vector<8x128xf32>
    %54 = arith.addf %51, %53 : vector<8x128xf32>
    %cst_37 = arith.constant 0.000000e+00 : f32
    %55 = vector.broadcast %cst_37 : f32 to vector<8x128xf32>
    %56 = arith.cmpf oge, %54, %55 : vector<8x128xf32>
    %cst_38 = arith.constant 0.00999999977 : f32
    %57 = vector.broadcast %cst_38 : f32 to vector<8x128xf32>
    %58 = arith.mulf %57, %54 : vector<8x128xf32>
    %59 = arith.select %56, %54, %58 : vector<8x128xi1>, vector<8x128xf32>
    %c0_39 = arith.constant 0 : index
    %c0_40 = arith.constant 0 : index
    %60 = vector.load %arg13[%c0_39, %c0_40] : memref<128x128xf32, #tpu.memory_space<vmem>>, vector<128x128xf32>
    %cst_41 = arith.constant dense<0.000000e+00> : vector<8x128xf32>
    %61 = tpu.matmul %48, %60, %cst_41 {dimension_numbers = #tpu.dot_dimension_numbers<[1], [0], [0], [1], [0, 0, 1, 1], [], []>} : vector<8x128xf32>, vector<128x128xf32>, vector<8x128xf32> -> vector<8x128xf32>
    %c0_42 = arith.constant 0 : index
    %c0_43 = arith.constant 0 : index
    %62 = vector.load %arg16[%c0_42, %c0_43] : memref<128x128xf32, #tpu.memory_space<vmem>>, vector<128x128xf32>
    %cst_44 = arith.constant dense<0.000000e+00> : vector<8x128xf32>
    %63 = tpu.matmul %59, %62, %cst_44 {dimension_numbers = #tpu.dot_dimension_numbers<[1], [0], [0], [1], [0, 0, 1, 1], [], []>} : vector<8x128xf32>, vector<128x128xf32>, vector<8x128xf32> -> vector<8x128xf32>
    %64 = arith.addf %61, %63 : vector<8x128xf32>
    %c0_45 = arith.constant 0 : index
    %c0_46 = arith.constant 0 : index
    %65 = vector.load %arg17[%c0_45, %c0_46] : memref<1x128xf32, #tpu.memory_space<vmem>>, vector<1x128xf32>
    %66 = vector.broadcast %65 : vector<1x128xf32> to vector<8x128xf32>
    %67 = arith.addf %64, %66 : vector<8x128xf32>
    %c0_47 = arith.constant 0 : index
    %c0_48 = arith.constant 0 : index
    %68 = vector.load %arg18[%c0_47, %c0_48] : memref<8x128xf32, #tpu.memory_space<vmem>>, vector<8x128xf32>
    tpu.vector_store %arg18[%c0_47, %c0_48], %67 {strides = array<i32>} : memref<8x128xf32, #tpu.memory_space<vmem>>, vector<8x128xf32>,
    return
  }
}

</mosaic_0001>

<bundles_post_ra>
// kernel: mlp_forward.1
= control target key start
LH: loop header
LB: loop body
LE: loop exit
PB: predicated region body
PF: predicated region fallthrough
CT: control target
= control target key end

     0   :  { %v995_v0 = vmov 0.0|0.0   ;;  %vm996_vm0 = vmmov 0   ;;  %v997_v4 = vmov 0.0   ;;  %s1425_s1 = inlined_call_operand.vmem [shape: f32[128,128], index: 1, kind: input, shape index: {}]   ;;  %s1426_s5 = inlined_call_operand.vmem [shape: f32[128,128], index: 5, kind: input, shape index: {}]   ;;  %s1427_s0 = inlined_call_operand.vmem [shape: f32[8,128], index: 0, kind: input, shape index: {}]   ;;  %s1428_s9 = inlined_call_operand.vmem [shape: f32[128,128], index: 9, kind: input, shape index: {}]   ;;  %s1429_s2 = inlined_call_operand.vmem [shape: f32[1,128], index: 2, kind: input, shape index: {}]   ;;  %s1430_s3 = inlined_call_operand.vmem [shape: f32[1,128], index: 3, kind: input, shape index: {}]   ;;  %s1431_s4 = inlined_call_operand.vmem [shape: f32[1,128], index: 4, kind: input, shape index: {}]   ;;  %s1432_s16 = inlined_call_operand.vmem [shape: f32[128,128], index: 16, kind: input, shape index: {}]   ;;  %s1433_s6 = inlined_call_operand.vmem [shape: f32[1,128], index: 6, kind: input, shape index: {}]   ;;  %s1434_s7 = inlined_call_operand.vmem [shape: f32[1,128], index: 7, kind: input, shape index: {}]   ;;  %s1435_s8 = inlined_call_operand.vmem [shape: f32[1,128], index: 8, kind: input, shape index: {}]   ;;  %s1436_s13 = inlined_call_operand.vmem [shape: f32[128,128], index: 13, kind: input, shape index: {}]   ;;  %s1437_s10 = inlined_call_operand.vmem [shape: f32[1,128], index: 10, kind: input, shape index: {}]   ;;  %s1438_s11 = inlined_call_operand.vmem [shape: f32[1,128], index: 11, kind: input, shape index: {}]   ;;  %s1439_s14 = inlined_call_operand.vmem [shape: f32[1,128], index: 14, kind: input, shape index: {}]   ;;  %s1440_s12 = inlined_call_operand.vmem [shape: f32[1,128], index: 12, kind: input, shape index: {}]   ;;  %s1441_s15 = inlined_call_operand.vmem [shape: f32[1,128], index: 15, kind: input, shape index: {}]   ;;  %s1442_s17 = inlined_call_operand.vmem [shape: f32[1,128], index: 17, kind: input, shape index: {}]   ;;  %s1443_s18 = inlined_call_operand.vmem [shape: f32[8,128], index: 18, kind: output, shape index: {}]  }
   0x1   :  { %1446 = sst [smem:[#allocation2_spill]] %s1425_s1  ;;  %872 = vmatprep.subr.bf16.mxu0 %v995_v0  ;;  %729 = vmatprep.mubr.msk.f32.mxu0 %vm996_vm0, %v997_v4  ;;  %v284_v51 = vld [vmem:[%s1428_s9] sm:$0xff]  ;;  %v285_v52 = vld [vmem:[%s1428_s9 + $0x8] sm:$0xff]  ;;  %v286_v53 = vld [vmem:[%s1428_s9 + $0x10] sm:$0xff] }
   0x2   :  { %1447 = sst [smem:[#allocation3_spill]] %s1426_s5  ;;  %s1449_s29 = sld [smem:[#allocation2_spill]]  ;;  %896 = vmatprep.subr.bf16.mxu1 %v995_v0  ;;  %764 = vmatprep.mubr.msk.f32.mxu1 %vm996_vm0, %v997_v4  ;;  %v921_v54 = vpack.c.bf16 %v285_v52, %v284_v51  ;;  %v287_v55 = vld [vmem:[%s1428_s9 + $0x18] sm:$0xff]  ;;  %v288_v57 = vld [vmem:[%s1428_s9 + $0x20] sm:$0xff]  ;;  %v289_v58 = vld [vmem:[%s1428_s9 + $0x28] sm:$0xff] }
   0x3   :  { %1448 = sst [smem:[#allocation4_spill]] %s1427_s0  ;;  %s1450_s27 = sld [smem:[#allocation3_spill]]  ;;  %v924_v56 = vpack.c.bf16 %v287_v55, %v286_v53  ;;  %v927_v59 = vpack.c.bf16 %v289_v58, %v288_v57  ;;  %v290_v60 = vld [vmem:[%s1428_s9 + $0x30] sm:$0xff]  ;;  %v291_v61 = vld [vmem:[%s1428_s9 + $0x38] sm:$0xff]  ;;  %v292_v63 = vld [vmem:[%s1428_s9 + $0x40] sm:$0xff] }
   0x4   :  { %s1451_s20 = sld [smem:[#allocation4_spill]]  ;;  %v930_v62 = vpack.c.bf16 %v291_v61, %v290_v60  ;;  %v417_v53 = vld [vmem:[%s1436_s13 + $0x10] sm:$0xff]  ;;  %v419_v57 = vld [vmem:[%s1436_s13 + $0x20] sm:$0xff]  ;;  %v420_v58 = vld [vmem:[%s1436_s13 + $0x28] sm:$0xff] }
   0x5   :  { %v421_v60 = vld [vmem:[%s1436_s13 + $0x30] sm:$0xff] }
   0x8   :  { %v60_v1 = vld [vmem:[%s1449_s29] sm:$0xff]  ;;  %v61_v2 = vld [vmem:[%s1449_s29 + $0x8] sm:$0xff]  ;;  %v62_v3 = vld [vmem:[%s1449_s29 + $0x10] sm:$0xff] }
   0x9   :  { %v873_v5 = vpack.c.bf16 %v61_v2, %v60_v1  ;;  %v63_v6 = vld [vmem:[%s1449_s29 + $0x18] sm:$0xff]  ;;  %v64_v8 = vld [vmem:[%s1449_s29 + $0x20] sm:$0xff]  ;;  %v65_v9 = vld [vmem:[%s1449_s29 + $0x28] sm:$0xff] }
   0xa   :  { %v876_v7 = vpack.c.bf16 %v63_v6, %v62_v3  ;;  %v172_v10 = vld [vmem:[%s1450_s27] sm:$0xff]  ;;  %v173_v11 = vld [vmem:[%s1450_s27 + $0x8] sm:$0xff]  ;;  %v174_v12 = vld [vmem:[%s1450_s27 + $0x10] sm:$0xff]  ;;  %v879_v14 = vpack.c.bf16 %v65_v9, %v64_v8 }
   0xb   :  { %874 = vmatpush3.bf16.msra.mxu0 %v873_v5  ;;  %v175_v13 = vld [vmem:[%s1450_s27 + $0x18] sm:$0xff]  ;;  %v897_v15 = vpack.c.bf16 %v173_v11, %v172_v10  ;;  %v66_v16 = vld [vmem:[%s1449_s29 + $0x30] sm:$0xff]  ;;  %v176_v19 = vld [vmem:[%s1450_s27 + $0x20] sm:$0xff] }
   0xc   :  { %875 = vmatprep.subr.bf16.mxu0 %v995_v0  ;;  %v67_v17 = vld [vmem:[%s1449_s29 + $0x38] sm:$0xff]  ;;  %v900_v18 = vpack.c.bf16 %v175_v13, %v174_v12  ;;  %v177_v20 = vld [vmem:[%s1450_s27 + $0x28] sm:$0xff]  ;;  %v68_v22 = vld [vmem:[%s1449_s29 + $0x40] sm:$0xff] }
   0xd   :  { %898 = vmatpush3.bf16.msra.mxu1 %v897_v15  ;;  %v882_v21 = vpack.c.bf16 %v67_v17, %v66_v16  ;;  %v69_v23 = vld [vmem:[%s1449_s29 + $0x48] sm:$0xff]  ;;  %v903_v24 = vpack.c.bf16 %v177_v20, %v176_v19  ;;  %v178_v25 = vld [vmem:[%s1450_s27 + $0x30] sm:$0xff]  ;;  %v179_v26 = vld [vmem:[%s1450_s27 + $0x38] sm:$0xff] }
   0xe   :  { %899 = vmatprep.subr.bf16.mxu1 %v995_v0  ;;  %v885_v27 = vpack.c.bf16 %v69_v23, %v68_v22  ;;  %v70_v28 = vld [vmem:[%s1449_s29 + $0x50] sm:$0xff]  ;;  %v71_v29 = vld [vmem:[%s1449_s29 + $0x58] sm:$0xff]  ;;  %v906_v30 = vpack.c.bf16 %v179_v26, %v178_v25  ;;  %v180_v31 = vld [vmem:[%s1450_s27 + $0x40] sm:$0xff] }
   0xf   :  { %877 = vmatpush3.bf16.msra.mxu0 %v876_v7  ;;  %v181_v32 = vld [vmem:[%s1450_s27 + $0x48] sm:$0xff]  ;;  %v888_v33 = vpack.c.bf16 %v71_v29, %v70_v28  ;;  %v72_v34 = vld [vmem:[%s1449_s29 + $0x60] sm:$0xff]  ;;  %v182_v37 = vld [vmem:[%s1450_s27 + $0x50] sm:$0xff] }
  0x10   :  { %878 = vmatprep.subr.bf16.mxu0 %v995_v0  ;;  %v73_v35 = vld [vmem:[%s1449_s29 + $0x68] sm:$0xff]  ;;  %v909_v36 = vpack.c.bf16 %v181_v32, %v180_v31  ;;  %v183_v38 = vld [vmem:[%s1450_s27 + $0x58] sm:$0xff]  ;;  %v74_v40 = vld [vmem:[%s1449_s29 + $0x70] sm:$0xff] }
  0x11   :  { %901 = vmatpush3.bf16.msra.mxu1 %v900_v18  ;;  %v891_v39 = vpack.c.bf16 %v73_v35, %v72_v34  ;;  %v75_v41 = vld [vmem:[%s1449_s29 + $0x78] sm:$0xff]  ;;  %v912_v42 = vpack.c.bf16 %v183_v38, %v182_v37  ;;  %v59_v44 = vld [vmem:[%s1451_s20] sm:$0xff]  ;;  %v185_v46 = vld [vmem:[%s1450_s27 + $0x68] sm:$0xff] }
  0x12   :  { %902 = vmatprep.subr.bf16.mxu1 %v995_v0  ;;  %v894_v43 = vpack.c.bf16 %v75_v41, %v74_v40  ;;  %v184_v45 = vld [vmem:[%s1450_s27 + $0x60] sm:$0xff]  ;;  %v186_v48 = vld [vmem:[%s1450_s27 + $0x70] sm:$0xff]  ;;  %v187_v49 = vld [vmem:[%s1450_s27 + $0x78] sm:$0xff] }
  0x13   :  { %880 = vmatpush3.bf16.msra.mxu0 %v879_v14  ;;  %v915_v47 = vpack.c.bf16 %v185_v46, %v184_v45  ;;  %v918_v50 = vpack.c.bf16 %v187_v49, %v186_v48  ;;  %v293_v1 = vld [vmem:[%s1428_s9 + $0x48] sm:$0xff]  ;;  %v294_v3 = vld [vmem:[%s1428_s9 + $0x50] sm:$0xff]  ;;  %v295_v5 = vld [vmem:[%s1428_s9 + $0x58] sm:$0xff] }
  0x14   :  { %881 = vmatprep.subr.bf16.mxu0 %v995_v0  ;;  %v933_v2 = vpack.c.bf16 %v293_v1, %v292_v63  ;;  %v936_v6 = vpack.c.bf16 %v295_v5, %v294_v3  ;;  %v600_v7 = vld [vmem:[%s1429_s2] ss:$0 sm:$0xff]  ;;  %v297_v18 = vld [vmem:[%s1428_s9 + $0x68] sm:$0xff]  ;;  %v298_v20 = vld [vmem:[%s1428_s9 + $0x70] sm:$0xff] }
  0x15   :  { %904 = vmatpush3.bf16.msra.mxu1 %v903_v24  ;;  %v601_v9 = vld [vmem:[%s1430_s3] ss:$0 sm:$0xff]  ;;  %v432_v24 = vld [vmem:[%s1432_s16 + $0x8] sm:$0xff]  ;;  %v433_v26 = vld [vmem:[%s1432_s16 + $0x10] sm:$0xff] }
  0x16   :  { %905 = vmatprep.subr.bf16.mxu1 %v995_v0  ;;  %v602_v12 = vld [vmem:[%s1431_s4] ss:$0 sm:$0xff]  ;;  %v437_v32 = vld [vmem:[%s1432_s16 + $0x30] sm:$0xff]  ;;  %v416_v49 = vld [vmem:[%s1436_s13 + $0x8] sm:$0xff] }
  0x17   :  { %883 = vmatpush3.bf16.msra.mxu0 %v882_v21  ;;  %v296_v17 = vld [vmem:[%s1428_s9 + $0x60] sm:$0xff]  ;;  %v299_v21 = vld [vmem:[%s1428_s9 + $0x78] sm:$0xff]  ;;  %v441_v38 = vld [vmem:[%s1432_s16 + $0x50] sm:$0xff] }
  0x18   :  { %884 = vmatprep.subr.bf16.mxu0 %v995_v0  ;;  %v939_v19 = vpack.c.bf16 %v297_v18, %v296_v17  ;;  %v942_v22 = vpack.c.bf16 %v299_v21, %v298_v20  ;;  %v431_v23 = vld [vmem:[%s1432_s16] sm:$0xff]  ;;  %v424_v63 = vld [vmem:[%s1436_s13 + $0x48] sm:$0xff]  ;;  %v426_v3 = vld [vmem:[%s1436_s13 + $0x58] sm:$0xff] }
  0x19   :  { %907 = vmatpush3.bf16.msra.mxu1 %v906_v30  ;;  %v945_v25 = vpack.c.bf16 %v432_v24, %v431_v23  ;;  %v435_v29 = vld [vmem:[%s1432_s16 + $0x20] sm:$0xff]  ;;  %v436_v30 = vld [vmem:[%s1432_s16 + $0x28] sm:$0xff] }
  0x1a   :  { %908 = vmatprep.subr.bf16.mxu1 %v995_v0  ;;  %v951_v31 = vpack.c.bf16 %v436_v30, %v435_v29  ;;  %v439_v35 = vld [vmem:[%s1432_s16 + $0x40] sm:$0xff] }
  0x1b   :  { %886 = vmatpush3.bf16.msra.mxu0 %v885_v27  ;;  %v434_v27 = vld [vmem:[%s1432_s16 + $0x18] sm:$0xff]  ;;  %v603_v41 = vld [vmem:[%s1433_s6] ss:$0 sm:$0xff] }
  0x1c   :  { %887 = vmatprep.subr.bf16.mxu0 %v995_v0  ;;  %v948_v28 = vpack.c.bf16 %v434_v27, %v433_v26  ;;  %v605_v46 = vld [vmem:[%s1435_s8] ss:$0 sm:$0xff] }
  0x1d   :  { %910 = vmatpush3.bf16.msra.mxu1 %v909_v36  ;;  %v440_v36 = vld [vmem:[%s1432_s16 + $0x48] sm:$0xff]  ;;  %v415_v48 = vld [vmem:[%s1436_s13] sm:$0xff] }
  0x1e   :  { %911 = vmatprep.subr.bf16.mxu1 %v995_v0  ;;  %v957_v37 = vpack.c.bf16 %v440_v36, %v439_v35  ;;  %v969_v52 = vpack.c.bf16 %v416_v49, %v415_v48  ;;  %v606_v18 = vld [vmem:[%s1437_s10] ss:$0 sm:$0xff] }
  0x1f   :  { %889 = vmatpush3.bf16.msra.mxu0 %v888_v33  ;;  %v438_v33 = vld [vmem:[%s1432_s16 + $0x38] sm:$0xff]  ;;  %v609_v20 = vld [vmem:[%s1439_s14] ss:$0 sm:$0xff] }
  0x20   :  { %890 = vmatprep.subr.bf16.mxu0 %v995_v0  ;;  %v954_v34 = vpack.c.bf16 %v438_v33, %v437_v32  ;;  %v608_v23 = vld [vmem:[%s1440_s12] ss:$0 sm:$0xff] }
  0x21   :  { %913 = vmatpush3.bf16.msra.mxu1 %v912_v42  ;;  %v610_v24 = vld [vmem:[%s1441_s15] ss:$0 sm:$0xff] }
  0x22   :  { %914 = vmatprep.subr.bf16.mxu1 %v995_v0  ;;  %v611_v35 = vld [vmem:[%s1442_s17] ss:$0 sm:$0xff] }
  0x23   :  { %892 = vmatpush3.bf16.msra.mxu0 %v891_v39  ;;  %v442_v39 = vld [vmem:[%s1432_s16 + $0x58] sm:$0xff] }
  0x24   :  { %893 = vmatprep.subr.bf16.mxu0 %v995_v0  ;;  %v960_v40 = vpack.c.bf16 %v442_v39, %v441_v38 }
  0x25   :  { %916 = vmatpush3.bf16.msra.mxu1 %v915_v47 }
  0x26   :  { %917 = vmatprep.subr.bf16.mxu1 %v995_v0 }
  0x27   :  { %895 = vmatpush3.bf16.msra.mxu0 %v894_v43  ;;  %v604_v43 = vld [vmem:[%s1434_s7] ss:$0 sm:$0xff] }
  0x28   :  { %920 = vmatprep.subr.bf16.mxu0 %v995_v0 }
  0x29   :  { %919 = vmatpush3.bf16.msra.mxu1 %v918_v50 }
  0x2a   :  { %730 = vmatmul.mubr.f32.vlgmr.msra.gmra.mrb[0].mxu0 %v59_v44  ;;  %944 = vmatprep.subr.bf16.mxu1 %v995_v0 }
  0x2b   :  { %799 = vmatprep.mubr.msk.f32.mxu0 %vm996_vm0, %v997_v4  ;;  %922 = vmatpush3.bf16.msra.mxu0 %v921_v54  ;;  %v418_v54 = vld [vmem:[%s1436_s13 + $0x18] sm:$0xff] }
  0x2c   :  { %923 = vmatprep.subr.bf16.mxu0 %v995_v0 }
  0x2f   :  { %925 = vmatpush3.bf16.msra.mxu0 %v924_v56  ;;  %v972_v56 = vpack.c.bf16 %v418_v54, %v417_v53 }
  0x30   :  { %926 = vmatprep.subr.bf16.mxu0 %v995_v0 }
  0x33   :  { %928 = vmatpush3.bf16.msra.mxu0 %v927_v59  ;;  %v975_v59 = vpack.c.bf16 %v420_v58, %v419_v57 }
  0x34   :  { %929 = vmatprep.subr.bf16.mxu0 %v995_v0 }
  0x37   :  { %931 = vmatpush3.bf16.msra.mxu0 %v930_v62  ;;  %v423_v62 = vld [vmem:[%s1436_s13 + $0x40] sm:$0xff] }
  0x38   :  { %932 = vmatprep.subr.bf16.mxu0 %v995_v0  ;;  %v981_v1 = vpack.c.bf16 %v424_v63, %v423_v62 }
  0x3b   :  { %934 = vmatpush3.bf16.msra.mxu0 %v933_v2  ;;  %v425_v2 = vld [vmem:[%s1436_s13 + $0x50] sm:$0xff] }
  0x3c   :  { %935 = vmatprep.subr.bf16.mxu0 %v995_v0  ;;  %v984_v5 = vpack.c.bf16 %v426_v3, %v425_v2 }
  0x3f   :  { %937 = vmatpush3.bf16.msra.mxu0 %v936_v6  ;;  %v443_v6 = vld [vmem:[%s1432_s16 + $0x60] sm:$0xff] }
  0x40   :  { %938 = vmatprep.subr.bf16.mxu0 %v995_v0 }
  0x43   :  { %940 = vmatpush3.bf16.msra.mxu0 %v939_v19 }
  0x44   :  { %941 = vmatprep.subr.bf16.mxu0 %v995_v0 }
  0x47   :  { %943 = vmatpush3.bf16.msra.mxu0 %v942_v22 }
  0x48   :  { %968 = vmatprep.subr.bf16.mxu0 %v995_v0 }
  0xfd   :  { %v149_v8 = vpop.f32.mrb[0].mxu0 }
  0xfe   :  { %v150_v10 = vadd.f32 %v600_v7, %v149_v8  ;;  %v731_v11 = vpop.f32.mrb[1].mxu0  ;;  %v444_v7 = vld [vmem:[%s1432_s16 + $0x68] sm:$0xff]  ;;  %v427_v8 = vld [vmem:[%s1436_s13 + $0x60] sm:$0xff] }
 0x100   :  { %v161_v13 = vmul.f32 %v601_v9, %v150_v10  ;;  %v963_v9 = vpack.c.bf16 %v444_v7, %v443_v6  ;;  %v428_v10 = vld [vmem:[%s1436_s13 + $0x68] sm:$0xff] }
 0x101   :  { %v987_v11 = vpack.c.bf16 %v428_v10, %v427_v8 }
 0x102   :  { %v168_v14 = vadd.f32 %v602_v12, %v161_v13  ;;  %v445_v12 = vld [vmem:[%s1432_s16 + $0x70] sm:$0xff]  ;;  %v446_v13 = vld [vmem:[%s1432_s16 + $0x78] sm:$0xff] }
 0x104   :  { %vm169_vm1 = vcmp.ge.f32.partialorder %v168_v14, 0.0  ;;  %v170_v15 = vmul.f32 0.01, %v168_v14 }
 0x106   :  { %v171_v16 = vsel %vm169_vm1, %v168_v14, %v170_v15  ;;  %v966_v14 = vpack.c.bf16 %v446_v13, %v445_v12  ;;  %v429_v15 = vld [vmem:[%s1436_s13 + $0x70] sm:$0xff] }
 0x107   :  { %765 = vmatmul.mubr.f32.vlgmr.msra.gmra.mrb[0].mxu1 %v171_v16  ;;  %v430_v16 = vld [vmem:[%s1436_s13 + $0x78] sm:$0xff] }
 0x108   :  { %834 = vmatprep.mubr.msk.f32.mxu1 %vm996_vm0, %v997_v4  ;;  %946 = vmatpush3.bf16.msra.mxu1 %v945_v25  ;;  %v990_v17 = vpack.c.bf16 %v430_v16, %v429_v15 }
 0x109   :  { %947 = vmatprep.subr.bf16.mxu1 %v995_v0 }
 0x10c   :  { %949 = vmatpush3.bf16.msra.mxu1 %v948_v28 }
 0x10d   :  { %950 = vmatprep.subr.bf16.mxu1 %v995_v0 }
 0x110   :  { %952 = vmatpush3.bf16.msra.mxu1 %v951_v31 }
 0x111   :  { %953 = vmatprep.subr.bf16.mxu1 %v995_v0 }
 0x114   :  { %955 = vmatpush3.bf16.msra.mxu1 %v954_v34 }
 0x115   :  { %956 = vmatprep.subr.bf16.mxu1 %v995_v0 }
 0x118   :  { %958 = vmatpush3.bf16.msra.mxu1 %v957_v37 }
 0x119   :  { %959 = vmatprep.subr.bf16.mxu1 %v995_v0 }
 0x11c   :  { %961 = vmatpush3.bf16.msra.mxu1 %v960_v40 }
 0x11d   :  { %962 = vmatprep.subr.bf16.mxu1 %v995_v0 }
 0x120   :  { %964 = vmatpush3.bf16.msra.mxu1 %v963_v9 }
 0x121   :  { %965 = vmatprep.subr.bf16.mxu1 %v995_v0 }
 0x124   :  { %967 = vmatpush3.bf16.msra.mxu1 %v966_v14 }
 0x1da   :  { %v261_v42 = vpop.f32.mrb[0].mxu1 }
 0x1db   :  { %v262_v44 = vadd.f32 %v603_v41, %v261_v42  ;;  %v766_v45 = vpop.f32.mrb[1].mxu1 }
 0x1dd   :  { %v273_v47 = vmul.f32 %v604_v43, %v262_v44 }
 0x1df   :  { %v280_v50 = vadd.f32 %v605_v46, %v273_v47 }
 0x1e1   :  { %vm281_vm2 = vcmp.ge.f32.partialorder %v280_v50, 0.0  ;;  %v282_v51 = vmul.f32 0.01, %v280_v50 }
 0x1e3   :  { %v283_v55 = vsel %vm281_vm2, %v280_v50, %v282_v51 }
 0x1e4   :  { %800 = vmatmul.mubr.f32.vlgmr.msra.gmra.mrb[2].mxu0 %v283_v55 }
 0x1e5   :  { %970 = vmatpush3.bf16.msra.mxu0 %v969_v52  ;;  %869 = vmatprep.mubr.msk.f32.mxu0 %vm996_vm0, %v997_v4  ;;  %v422_v4 = vld [vmem:[%s1436_s13 + $0x38] sm:$0xff] }
 0x1e6   :  { %971 = vmatprep.subr.bf16.mxu0 %v995_v0  ;;  %v978_v61 = vpack.c.bf16 %v422_v4, %v421_v60 }
 0x1e9   :  { %973 = vmatpush3.bf16.msra.mxu0 %v972_v56 }
 0x1ea   :  { %974 = vmatprep.subr.bf16.mxu0 %v995_v0 }
 0x1ed   :  { %976 = vmatpush3.bf16.msra.mxu0 %v975_v59 }
 0x1ee   :  { %977 = vmatprep.subr.bf16.mxu0 %v995_v0 }
 0x1f1   :  { %979 = vmatpush3.bf16.msra.mxu0 %v978_v61 }
 0x1f2   :  { %980 = vmatprep.subr.bf16.mxu0 %v995_v0 }
 0x1f5   :  { %982 = vmatpush3.bf16.msra.mxu0 %v981_v1 }
 0x1f6   :  { %983 = vmatprep.subr.bf16.mxu0 %v995_v0 }
 0x1f9   :  { %985 = vmatpush3.bf16.msra.mxu0 %v984_v5 }
 0x1fa   :  { %986 = vmatprep.subr.bf16.mxu0 %v995_v0 }
 0x1fd   :  { %988 = vmatpush3.bf16.msra.mxu0 %v987_v11 }
 0x1fe   :  { %989 = vmatprep.subr.bf16.mxu0 %v995_v0  ;;  %v607_v0 = vld [vmem:[%s1438_s11] ss:$0 sm:$0xff] }
 0x201   :  { %991 = vmatpush3.bf16.msra.mxu0 %v990_v17 }
 0x2b7   :  { %v373_v19 = vpop.f32.mrb[2].mxu0 }
 0x2b8   :  { %v374_v21 = vadd.f32 %v606_v18, %v373_v19  ;;  %v801_v22 = vpop.f32.mrb[3].mxu0 }
 0x2ba   :  { %v384_v25 = vmul.f32 %v607_v0, %v374_v21  ;;  %v403_v26 = vmul.f32 %v609_v20, %v374_v21 }
 0x2bc   :  { %v392_v27 = vadd.f32 %v608_v23, %v384_v25  ;;  %v411_v28 = vadd.f32 %v610_v24, %v403_v26 }
 0x2be   :  { %vm412_vm3 = vcmp.ge.f32.partialorder %v411_v28, 0.0  ;;  %v413_v29 = vmul.f32 0.01, %v411_v28  ;;  %vm393_vm4 = vcmp.ge.f32.partialorder %v392_v27, 0.0  ;;  %v394_v30 = vmul.f32 0.01, %v392_v27 }
 0x2c0   :  { %v414_v31 = vsel %vm412_vm3, %v411_v28, %v413_v29  ;;  %v395_v32 = vsel %vm393_vm4, %v392_v27, %v394_v30 }
 0x2c1   :  { %835 = vmatmul.mubr.f32.vlgmr.msra.gmra.mrb[2].mxu1 %v414_v31  ;;  %870 = vmatmul.mubr.f32.vlgmr.msra.gmra.mrb[4].mxu0 %v395_v32 }
 0x394   :  { %v513_v33 = vpop.f32.mrb[2].mxu1  ;;  %v583_v34 = vpop.f32.mrb[4].mxu0 }
 0x395   :  { %v584_v36 = vadd.f32 %v583_v34, %v513_v33  ;;  %v836_v37 = vpop.f32.mrb[3].mxu1  ;;  %v871_v38 = vpop.f32.mrb[5].mxu0 }
 0x397   :  { %v594_v39 = vadd.f32 %v611_v35, %v584_v36 }
 0x399   :  { %595 = vst [vmem:[%s1443_s18] sm:$0xff] %v594_v39 }

</bundles_post_ra>
